<compile_context>
chip_gen: v7x
topology: tpu7x:2x2x1
jax: 0.10.0
libtpu: 0.0.40
codegen_flags: <defaults>
</compile_context>

<pallas_src>
import jax
import jax.numpy as jnp
from jax.experimental import pallas as pl
from jax.experimental.pallas import tpu as pltpu

_LANE = 128
_TARGET_COLS = 4096                      # lane-dense store width (multiple of 128)
_TARGET_BLOCK_BYTES = 4 * 1024 * 1024    # ~4 MiB per block; ~4x in flight = 16 MiB
_VMEM_LIMIT_BYTES = 32 * 1024 * 1024


def _identity_kernel(x_ref, o_ref):
    # Pure pass-through: RDBPBlock.forward(x) == x.  Straight VMEM copy,
    # no elementwise work (keeps v5e's single vst slot fully effective).
    o_ref[...] = x_ref[...]


def _slab_shape(n: int) -> tuple[int, int]:
    """Pick a (rows, cols) factorization of n with lane-dense cols (no padding)."""
    if n % _LANE != 0:
        # Ragged size: present the whole array as a single full-extent block
        # (Pallas allows block_shape == full dims even if not (8,128)-divisible).
        return 1, n
    rows, cols = n // _LANE, _LANE
    # Widen lanes for unmasked wide stores, but never drop rows below 8 so the
    # sublane dimension stays dense.
    while cols < _TARGET_COLS and rows >= 16 and rows % 2 == 0:
        cols *= 2
        rows //= 2
    return rows, cols


def _row_tile(rows: int, cols: int, itemsize: int) -> int:
    """Largest row tile (multiple of 8 dividing rows, or rows itself) within budget."""
    max_rows = max(1, _TARGET_BLOCK_BYTES // (cols * itemsize))
    if rows <= max_rows:
        # Whole slab fits one block.  Prefer >=2 grid steps (v7x has 2 TCs)
        # when we can split evenly without violating the (8,128) rule.
        if rows >= 16 and rows % 16 == 0:
            return rows // 2
        return rows
    cand = (max_rows // 8) * 8
    while cand >= 8:
        if rows % cand == 0:
            return cand
        cand -= 8
    return rows  # no clean divisor: one full-extent block (still no padding)


def rdbp_block(x: jax.Array) -> jax.Array:
    """Forward pass of RDBPBlock: identity, executed as a Pallas TPU copy kernel."""
    orig_shape = x.shape
    n = x.size
    if n == 0:
        return x

    itemsize = jnp.dtype(x.dtype).itemsize

    if n % _LANE != 0 and n * itemsize > _TARGET_BLOCK_BYTES:
        # Rare ragged case on large tensors: fall back to a padded slab.
        # TODO(synk): replace full-array pad with a masked ragged-tail block.
        pad = (-n) % (_LANE * 8)
        flat = jnp.pad(x.reshape(-1), (0, pad))
        return rdbp_block(flat)[:n].reshape(orig_shape)

    rows, cols = _slab_shape(n)
    slab = x.reshape(rows, cols)            # free metadata reshape, no HBM traffic
    tile = _row_tile(rows, cols, itemsize)
    grid = (rows // tile,)

    out_slab = pl.pallas_call(
        _identity_kernel,
        out_shape=jax.ShapeDtypeStruct((rows, cols), slab.dtype),
        grid_spec=pltpu.PrefetchScalarGridSpec(
            num_scalar_prefetch=0,
            grid=grid,
            in_specs=[pl.BlockSpec((tile, cols), lambda i: (i, 0))],
            out_specs=pl.BlockSpec((tile, cols), lambda i: (i, 0)),
        ),
        input_output_aliases={0: 0},        # pure copy: let XLA reuse the buffer
        cost_estimate=pl.CostEstimate(
            flops=0, transcendentals=0, bytes_accessed=2 * n * itemsize),
        compiler_params=pltpu.CompilerParams(
            dimension_semantics=("parallel",),
            vmem_limit_bytes=_VMEM_LIMIT_BYTES,
        ),
    )(slab)

    return out_slab.reshape(orig_shape)     # free metadata reshape


if __name__ == "__main__":
    key = jax.random.PRNGKey(0)
    # Small NCHW input consistent with a conv-style block: N=2, C=4, H=W=16.
    x = jax.random.normal(key, (2, 4, 16, 16), dtype=jnp.float32)

    fwd = jax.jit(rdbp_block)
    y = jax.block_until_ready(fwd(x))

    # Verify identity semantics exactly.
    assert y.shape == x.shape and y.dtype == x.dtype
    assert bool(jnp.all(y == x))

    print("KERNEL_OK")
</pallas_src>

<mosaic_0001>
module attributes {stable_mosaic.version = 11 : i64} {
  func.func @_identity_kernel(%arg0: i32, %arg1: memref<8x256xf32, #tpu.memory_space<vmem>>, %arg2: memref<8x256xf32, #tpu.memory_space<vmem>>) attributes {dimension_semantics = [#tpu.dimension_semantics<parallel>], iteration_bounds = array<i64: 1>, scalar_prefetch = 0 : i64, scratch_operands = 0 : i64, tpu.core_type = #tpu.core_type<tc>, window_params = [{transform_indices = @transform_0, window_bounds = array<i64: 8, 256>}, {transform_indices = @transform_1, window_bounds = array<i64: 8, 256>}]} {
    %c0 = arith.constant 0 : index
    %c0_0 = arith.constant 0 : index
    %0 = vector.load %arg1[%c0, %c0_0] : memref<8x256xf32, #tpu.memory_space<vmem>>, vector<8x256xf32>
    %c0_1 = arith.constant 0 : index
    %c0_2 = arith.constant 0 : index
    %1 = vector.load %arg2[%c0_1, %c0_2] : memref<8x256xf32, #tpu.memory_space<vmem>>, vector<8x256xf32>
    tpu.vector_store %arg2[%c0_1, %c0_2], %0 {strides = array<i32>} : memref<8x256xf32, #tpu.memory_space<vmem>>, vector<8x256xf32>,
    return
  }
  func.func @transform_0(%arg0: i32) -> (i32, i32) {
    %c0_i32 = arith.constant 0 : i32
    %c0_i32_0 = arith.constant 0 : i32
    return %arg0, %c0_i32 : i32, i32
  }
  func.func @transform_1(%arg0: i32) -> (i32, i32) {
    %c0_i32 = arith.constant 0 : i32
    %c0_i32_0 = arith.constant 0 : i32
    return %arg0, %c0_i32 : i32, i32
  }
}

</mosaic_0001>

<bundles_post_ra>
// kernel: rdbp_block.1
= control target key start
LH: loop header
LB: loop body
LE: loop exit
PB: predicated region body
PF: predicated region fallthrough
CT: control target
= control target key end

     0   :  { %s38_s0 = inlined_call_operand.vmem [shape: f32[8,256], index: 0, kind: input, shape index: {}, may-alias: {0,1}]   ;;  %s39_s1 = inlined_call_operand.vmem [shape: f32[8,256], index: 1, kind: output, shape index: {}, may-alias: {0,1}]  }
   0x1   :  { %v8_v0 = vld [vmem:[%s38_s0] sm:$0xff]  ;;  %v9_v1 = vld [vmem:[%s38_s0 + $0x8] sm:$0xff] }
   0x2   :  { %10 = vst [vmem:[%s39_s1] sm:$0xff] %v8_v0  ;;  %11 = vst [vmem:[%s39_s1 + $0x8] sm:$0xff] %v9_v1 }

</bundles_post_ra>
